<compile_context>
chip_gen: v7x
topology: tpu7x:2x2x1
jax: 0.10.0
libtpu: 0.0.40
codegen_flags: <defaults>
</compile_context>

<pallas_src>
import functools

import jax
import jax.numpy as jnp
from jax import lax
from jax.experimental import pallas as pl
from jax.experimental.pallas import tpu as pltpu


def _summary_kernel(xo_ref, xn_ref, wo_ref, wn_ref, b_ref, num_ref, den_ref,
                    *, n_total, tile_n, steps_per_core):
    # xo_ref : VMEM (tile_n, ino)   native dtype
    # xn_ref : VMEM (tile_n, inn)   native dtype
    # wo_ref : VMEM (1, ino)        native dtype (pre-split / pre-cast weight)
    # wn_ref : VMEM (1, inn)        native dtype
    # b_ref  : SMEM (1,) f32        fc1 bias
    # num_ref: VMEM (1, 1, inn) f32 per-core numerator   sum_i e_i * xn_i
    # den_ref: VMEM (1, 1, 1)   f32 per-core denominator sum_i e_i
    c = pl.program_id(0)          # core-shard axis ("parallel")
    s = pl.program_id(1)          # row-tile axis   ("arbitrary" reduction)

    @pl.when(s == 0)
    def _init():
        num_ref[...] = jnp.zeros_like(num_ref)
        den_ref[...] = jnp.zeros_like(den_ref)

    xo = xo_ref[...]              # (tile_n, ino)
    xn = xn_ref[...]              # (tile_n, inn)
    wo = wo_ref[...]              # (1, ino)
    wn = wn_ref[...]              # (1, inn)

    # Lane-dense logits: (1, tile_n) = wo . xo^T + wn . xn^T + b   (MXU, f32 acc)
    contract_last = (((1,), (1,)), ((), ()))
    logits = (
        lax.dot_general(wo, xo, contract_last, preferred_element_type=jnp.float32)
        + lax.dot_general(wn, xn, contract_last, preferred_element_type=jnp.float32)
        + b_ref[0]
    )                              # (1, tile_n) f32

    # e = exp(tanh(logits)) is bounded in [1/e, e]; no max-subtraction needed.
    e = jnp.exp(jnp.tanh(logits))  # (1, tile_n) f32

    # Logical (unclamped) row offset of this tile; clamped duplicate tiles
    # (from rounding the per-core step count up) mask out entirely.
    row0 = (c * steps_per_core + s) * tile_n
    is_partial = row0 + tile_n > n_total
    contract_num = (((1,), (0,)), ((), ()))

    @pl.when(jnp.logical_not(is_partial))
    def _full_tile():
        upd = lax.dot_general(e.astype(xn.dtype), xn, contract_num,
                              preferred_element_type=jnp.float32)   # (1, inn)
        num_ref[0] = num_ref[0] + upd
        den_ref[0] = den_ref[0] + jnp.sum(e, axis=-1, keepdims=True)

    @pl.when(is_partial)
    def _partial_tile():
        # Mask BOTH e and xn: the padded region of a partial block is
        # uninitialized, and 0*NaN in the matmul would corrupt the accumulator.
        lane_rows = row0 + lax.broadcasted_iota(jnp.int32, (1, tile_n), 1)
        e_m = jnp.where(lane_rows < n_total, e, 0.0)                 # (1, tile_n)
        sub_rows = row0 + lax.broadcasted_iota(jnp.int32, (tile_n, 1), 0)
        xn_m = jnp.where(sub_rows < n_total, xn, jnp.zeros_like(xn))  # (tile_n, inn)
        upd = lax.dot_general(e_m.astype(xn.dtype), xn_m, contract_num,
                              preferred_element_type=jnp.float32)
        num_ref[0] = num_ref[0] + upd
        den_ref[0] = den_ref[0] + jnp.sum(e_m, axis=-1, keepdims=True)


def _round_up(x, m):
    return (x + m - 1) // m * m


def summary_forward(xo, xn, weight, bias, *, tile_n=8192):
    """xo: (N, ino), xn: (N, inn), weight: (1, ino+inn), bias: (1,) -> (inn,)."""
    n, ino = xo.shape
    n2, inn = xn.shape
    assert n == n2, (xo.shape, xn.shape)
    assert weight.shape == (1, ino + inn), weight.shape

    itemsize = xo.dtype.itemsize
    # VMEM footprint per pipeline buffer with 128-lane padding of the feature
    # dims; x2 for double buffering.  Keep input buffers under ~16 MiB so the
    # kernel fits comfortably in the 32 MiB scoped VMEM on v5e/v6e/v7x.
    padded_row_bytes = (_round_up(ino, 128) + _round_up(inn, 128)) * itemsize
    vmem_budget = 16 * 1024 * 1024
    tile_cap = max(8, (vmem_budget // (2 * padded_row_bytes)) // 8 * 8)
    tile = min(tile_n, tile_cap)

    if n <= tile:
        tile = n                      # single full-extent block (no (8,128) rule)
    else:
        tile = (tile // 8) * 8
        assert tile % 8 == 0 and tile > 0, tile
    grid_n = pl.cdiv(n, tile)

    num_cores = 2                     # v7x: shard row tiles over both TCs;
    spc = pl.cdiv(grid_n, num_cores)  # harmless (one masked step) on 1-TC chips

    # Pre-split / pre-cast the weight once at trace time (avoids a per-step
    # lane-offset slice inside the kernel); bias stays f32 in SMEM.
    wo = weight[:, :ino].astype(xo.dtype)
    wn = weight[:, ino:].astype(xn.dtype)
    bias_f32 = bias.astype(jnp.float32)

    def row_map(ci, si):
        # Clamp so duplicate (over-counted) steps stay in bounds; the kernel
        # masks them out via the logical row offset.
        return (jnp.minimum(ci * spc + si, grid_n - 1), 0)

    kernel = functools.partial(_summary_kernel, n_total=n, tile_n=tile,
                               steps_per_core=spc)

    num, den = pl.pallas_call(
        kernel,
        out_shape=(
            jax.ShapeDtypeStruct((num_cores, 1, inn), jnp.float32),  # per-core numerator
            jax.ShapeDtypeStruct((num_cores, 1, 1), jnp.float32),    # per-core denominator
        ),
        grid=(num_cores, spc),
        in_specs=[
            pl.BlockSpec((tile, ino), row_map),                       # xo row tile
            pl.BlockSpec((tile, inn), row_map),                       # xn row tile
            pl.BlockSpec((1, ino), lambda ci, si: (0, 0)),            # wo
            pl.BlockSpec((1, inn), lambda ci, si: (0, 0)),            # wn
            pl.BlockSpec(memory_space=pltpu.MemorySpace.SMEM),        # bias (1,)
        ],
        out_specs=(
            pl.BlockSpec((1, 1, inn), lambda ci, si: (ci, 0, 0)),     # resident per core
            pl.BlockSpec((1, 1, 1), lambda ci, si: (ci, 0, 0)),
        ),
        compiler_params=pltpu.CompilerParams(
            dimension_semantics=("parallel", "arbitrary"),
            vmem_limit_bytes=32 * 1024 * 1024,
        ),
        cost_estimate=pl.CostEstimate(
            flops=int(2 * n * (ino + inn) + 2 * n * inn),
            transcendentals=int(2 * n),
            bytes_accessed=int(n * (ino + inn) * itemsize
                               + (ino + inn) * itemsize + 4 * (inn + 2)),
        ),
    )(xo, xn, wo, wn, bias_f32)

    # Combine the per-core partial sums and normalize with an exact divide
    # (the approximate reciprocal previously violated the 1e-4 tolerance).
    out = num.sum(axis=(0, 1)) / den.sum()
    return out.astype(xn.dtype)


def _reference(xo, xn, weight, bias):
    logits = jnp.concatenate([xo, xn], axis=1) @ weight.T + bias  # (N, 1)
    m = jnp.tanh(jnp.squeeze(logits, axis=1))
    m = jnp.exp(m) / jnp.exp(m).sum()
    return m @ xn


if __name__ == "__main__":
    key = jax.random.PRNGKey(0)
    k1, k2, k3, k4 = jax.random.split(key, 4)

    ino, inn = 16, 32
    N = 160

    xo = jax.random.normal(k1, (N, ino), dtype=jnp.float32)
    xn = jax.random.normal(k2, (N, inn), dtype=jnp.float32)

    # Deterministic fc1 parameters (Linear(ino+inn, 1)): weight (1, ino+inn), bias (1,)
    bound = 1.0 / jnp.sqrt(jnp.float32(ino + inn))
    weight = jax.random.uniform(k3, (1, ino + inn), minval=-bound, maxval=bound,
                                dtype=jnp.float32)
    bias = jax.random.uniform(k4, (1,), minval=-bound, maxval=bound,
                              dtype=jnp.float32)

    ref = _reference(xo, xn, weight, bias)

    # Multi-tile + two-core split: tile=64 -> blocks 0,1 full (fast path),
    # block 2 partial (masked path), block 3 clamped + fully masked.
    out = summary_forward(xo, xn, weight, bias, tile_n=64)
    jax.block_until_ready(out)
    assert out.shape == (inn,), out.shape
    assert jnp.allclose(out, ref, atol=1e-4, rtol=1e-4), (out, ref)

    # Tiny single-tile case (the original toy shapes); second core fully masked.
    out2 = summary_forward(xo[:8], xn[:8], weight, bias)
    jax.block_until_ready(out2)
    ref2 = _reference(xo[:8], xn[:8], weight, bias)
    assert jnp.allclose(out2, ref2, atol=1e-4, rtol=1e-4), (out2, ref2)

    # Default (large-tile, VMEM-budgeted) path on the full input.
    out3 = summary_forward(xo, xn, weight, bias)
    jax.block_until_ready(out3)
    assert jnp.allclose(out3, ref, atol=1e-4, rtol=1e-4), (out3, ref)

    print("KERNEL_OK")
</pallas_src>

<mosaic_0001>
module attributes {stable_mosaic.version = 11 : i64} {
  func.func @_summary_kernel(%arg0: i32, %arg1: i32, %arg2: memref<64x16xf32, #tpu.memory_space<vmem>>, %arg3: memref<64x32xf32, #tpu.memory_space<vmem>>, %arg4: memref<1x16xf32, #tpu.memory_space<vmem>>, %arg5: memref<1x32xf32, #tpu.memory_space<vmem>>, %arg6: memref<1xf32, #tpu.memory_space<smem>>, %arg7: memref<1x1x32xf32, #tpu.memory_space<vmem>>, %arg8: memref<1x1x1xf32, #tpu.memory_space<vmem>>) attributes {dimension_semantics = [#tpu.dimension_semantics<parallel>, #tpu.dimension_semantics<arbitrary>], iteration_bounds = array<i64: 2, 2>, scalar_prefetch = 0 : i64, scratch_operands = 0 : i64, tpu.core_type = #tpu.core_type<tc>, window_params = [{transform_indices = @transform_0, window_bounds = array<i64: 64, 16>}, {transform_indices = @transform_1, window_bounds = array<i64: 64, 32>}, {pipeline_mode = #tpu.pipeline_mode<synchronous>, transform_indices = @transform_2, window_bounds = array<i64: 1, 16>}, {pipeline_mode = #tpu.pipeline_mode<synchronous>, transform_indices = @transform_3, window_bounds = array<i64: 1, 32>}, {transform_indices = @transform_4, window_bounds = array<i64: 1>}, {transform_indices = @transform_5, window_bounds = array<i64: 1, 1, 32>}, {transform_indices = @transform_6, window_bounds = array<i64: 1, 1, 1>}]} {
    %c0_i32 = arith.constant 0 : i32
    %0 = arith.cmpi eq, %arg1, %c0_i32 : i32
    %1 = arith.extui %0 : i1 to i32
    %c0_i32_0 = arith.constant 0 : i32
    %2 = arith.cmpi ne, %1, %c0_i32_0 : i32
    scf.if %2 {
      %cst_13 = arith.constant 0.000000e+00 : f32
      %25 = vector.broadcast %cst_13 : f32 to vector<1x1x32xf32>
      %c0_14 = arith.constant 0 : index
      %c0_15 = arith.constant 0 : index
      %c0_16 = arith.constant 0 : index
      %26 = vector.load %arg7[%c0_14, %c0_15, %c0_16] : memref<1x1x32xf32, #tpu.memory_space<vmem>>, vector<1x1x32xf32>
      tpu.vector_store %arg7[%c0_14, %c0_15, %c0_16], %25 {strides = array<i32>} : memref<1x1x32xf32, #tpu.memory_space<vmem>>, vector<1x1x32xf32>,
      %cst_17 = arith.constant 0.000000e+00 : f32
      %27 = vector.broadcast %cst_17 : f32 to vector<1x1x1xf32>
      %c0_18 = arith.constant 0 : index
      %c0_19 = arith.constant 0 : index
      %c0_20 = arith.constant 0 : index
      %28 = vector.load %arg8[%c0_18, %c0_19, %c0_20] : memref<1x1x1xf32, #tpu.memory_space<vmem>>, vector<1x1x1xf32>
      tpu.vector_store %arg8[%c0_18, %c0_19, %c0_20], %27 {strides = array<i32>} : memref<1x1x1xf32, #tpu.memory_space<vmem>>, vector<1x1x1xf32>,
    } else {
    }
    %c0 = arith.constant 0 : index
    %c0_1 = arith.constant 0 : index
    %3 = vector.load %arg2[%c0, %c0_1] : memref<64x16xf32, #tpu.memory_space<vmem>>, vector<64x16xf32>
    %c0_2 = arith.constant 0 : index
    %c0_3 = arith.constant 0 : index
    %4 = vector.load %arg3[%c0_2, %c0_3] : memref<64x32xf32, #tpu.memory_space<vmem>>, vector<64x32xf32>
    %c0_4 = arith.constant 0 : index
    %c0_5 = arith.constant 0 : index
    %5 = vector.load %arg4[%c0_4, %c0_5] : memref<1x16xf32, #tpu.memory_space<vmem>>, vector<1x16xf32>
    %c0_6 = arith.constant 0 : index
    %c0_7 = arith.constant 0 : index
    %6 = vector.load %arg5[%c0_6, %c0_7] : memref<1x32xf32, #tpu.memory_space<vmem>>, vector<1x32xf32>
    %cst = arith.constant dense<0.000000e+00> : vector<1x64xf32>
    %7 = tpu.matmul %5, %3, %cst {dimension_numbers = #tpu.dot_dimension_numbers<[1], [1], [0], [0], [0, 0, 1, 0], [], []>} : vector<1x16xf32>, vector<64x16xf32>, vector<1x64xf32> -> vector<1x64xf32>
    %cst_8 = arith.constant dense<0.000000e+00> : vector<1x64xf32>
    %8 = tpu.matmul %6, %4, %cst_8 {dimension_numbers = #tpu.dot_dimension_numbers<[1], [1], [0], [0], [0, 0, 1, 0], [], []>} : vector<1x32xf32>, vector<64x32xf32>, vector<1x64xf32> -> vector<1x64xf32>
    %9 = arith.addf %7, %8 : vector<1x64xf32>
    %c0_9 = arith.constant 0 : index
    %10 = memref.load %arg6[%c0_9] : memref<1xf32, #tpu.memory_space<smem>>
    %11 = vector.broadcast %10 : f32 to vector<1x64xf32>
    %12 = arith.addf %9, %11 : vector<1x64xf32>
    %13 = math.tanh %12 : vector<1x64xf32>
    %14 = math.exp %13 : vector<1x64xf32>
    %c2_i32 = arith.constant 2 : i32
    %15 = arith.muli %arg0, %c2_i32 : i32
    %16 = arith.addi %15, %arg1 : i32
    %c64_i32 = arith.constant 64 : i32
    %17 = arith.muli %16, %c64_i32 : i32
    %c64_i32_10 = arith.constant 64 : i32
    %18 = arith.addi %17, %c64_i32_10 : i32
    %c160_i32 = arith.constant 160 : i32
    %19 = arith.cmpi sgt, %18, %c160_i32 : i32
    %true = arith.constant true
    %20 = arith.xori %19, %true : i1
    %21 = arith.extui %20 : i1 to i32
    %c0_i32_11 = arith.constant 0 : i32
    %22 = arith.cmpi ne, %21, %c0_i32_11 : i32
    scf.if %22 {
      %cst_13 = arith.constant dense<0.000000e+00> : vector<1x32xf32>
      %25 = tpu.matmul %14, %4, %cst_13 {dimension_numbers = #tpu.dot_dimension_numbers<[1], [0], [0], [1], [0, 0, 1, 1], [], []>} : vector<1x64xf32>, vector<64x32xf32>, vector<1x32xf32> -> vector<1x32xf32>
      %c0_14 = arith.constant 0 : index
      %c0_15 = arith.constant 0 : index
      %c0_16 = arith.constant 0 : index
      %26 = vector.load %arg7[%c0_14, %c0_15, %c0_16] : memref<1x1x32xf32, #tpu.memory_space<vmem>>, vector<1x1x32xf32>
      %27 = vector.shape_cast %26 : vector<1x1x32xf32> to vector<1x32xf32>
      %28 = arith.addf %27, %25 : vector<1x32xf32>
      %c0_17 = arith.constant 0 : index
      %c0_18 = arith.constant 0 : index
      %c0_19 = arith.constant 0 : index
      %29 = vector.load %arg7[%c0_17, %c0_18, %c0_19] : memref<1x1x32xf32, #tpu.memory_space<vmem>>, vector<1x1x32xf32>
      %30 = vector.shape_cast %29 : vector<1x1x32xf32> to vector<1x32xf32>
      %31 = vector.shape_cast %28 : vector<1x32xf32> to vector<1x1x32xf32>
      tpu.vector_store %arg7[%c0_17, %c0_18, %c0_19], %31 {strides = array<i32>} : memref<1x1x32xf32, #tpu.memory_space<vmem>>, vector<1x1x32xf32>,
      %c0_20 = arith.constant 0 : index
      %c0_21 = arith.constant 0 : index
      %c0_22 = arith.constant 0 : index
      %32 = vector.load %arg8[%c0_20, %c0_21, %c0_22] : memref<1x1x1xf32, #tpu.memory_space<vmem>>, vector<1x1x1xf32>
      %33 = vector.shape_cast %32 : vector<1x1x1xf32> to vector<1x1xf32>
      %cst_23 = arith.constant dense<0.000000e+00> : vector<1xf32>
      %34 = vector.multi_reduction <add>, %14, %cst_23 [1] : vector<1x64xf32> to vector<1xf32>
      %35 = vector.shape_cast %34 : vector<1xf32> to vector<1x1xf32>
      %36 = arith.addf %33, %35 : vector<1x1xf32>
      %c0_24 = arith.constant 0 : index
      %c0_25 = arith.constant 0 : index
      %c0_26 = arith.constant 0 : index
      %37 = vector.load %arg8[%c0_24, %c0_25, %c0_26] : memref<1x1x1xf32, #tpu.memory_space<vmem>>, vector<1x1x1xf32>
      %38 = vector.shape_cast %37 : vector<1x1x1xf32> to vector<1x1xf32>
      %39 = vector.shape_cast %36 : vector<1x1xf32> to vector<1x1x1xf32>
      tpu.vector_store %arg8[%c0_24, %c0_25, %c0_26], %39 {strides = array<i32>} : memref<1x1x1xf32, #tpu.memory_space<vmem>>, vector<1x1x1xf32>,
    } else {
    }
    %23 = arith.extui %19 : i1 to i32
    %c0_i32_12 = arith.constant 0 : i32
    %24 = arith.cmpi ne, %23, %c0_i32_12 : i32
    scf.if %24 {
      %25 = tpu.iota {dimensions = array<i32: 1>} : vector<1x64xi32>
      %26 = vector.broadcast %17 : i32 to vector<1x64xi32>
      %27 = arith.addi %26, %25 : vector<1x64xi32>
      %c160_i32_13 = arith.constant 160 : i32
      %28 = vector.broadcast %c160_i32_13 : i32 to vector<1x64xi32>
      %29 = arith.cmpi slt, %27, %28 : vector<1x64xi32>
      %cst_14 = arith.constant 0.000000e+00 : f32
      %30 = vector.broadcast %cst_14 : f32 to vector<1x64xf32>
      %31 = arith.select %29, %14, %30 : vector<1x64xi1>, vector<1x64xf32>
      %32 = tpu.iota {dimensions = array<i32: 0>} : vector<64x1xi32>
      %33 = vector.broadcast %17 : i32 to vector<64x1xi32>
      %34 = arith.addi %33, %32 : vector<64x1xi32>
      %c160_i32_15 = arith.constant 160 : i32
      %35 = vector.broadcast %c160_i32_15 : i32 to vector<64x1xi32>
      %36 = arith.cmpi slt, %34, %35 : vector<64x1xi32>
      %cst_16 = arith.constant 0.000000e+00 : f32
      %37 = vector.broadcast %cst_16 : f32 to vector<64x32xf32>
      %38 = vector.shape_cast %36 : vector<64x1xi1> to vector<64x1xi1>
      %39 = vector.broadcast %38 : vector<64x1xi1> to vector<64x32xi1>
      %40 = arith.select %39, %4, %37 : vector<64x32xi1>, vector<64x32xf32>
      %cst_17 = arith.constant dense<0.000000e+00> : vector<1x32xf32>
      %41 = tpu.matmul %31, %40, %cst_17 {dimension_numbers = #tpu.dot_dimension_numbers<[1], [0], [0], [1], [0, 0, 1, 1], [], []>} : vector<1x64xf32>, vector<64x32xf32>, vector<1x32xf32> -> vector<1x32xf32>
      %c0_18 = arith.constant 0 : index
      %c0_19 = arith.constant 0 : index
      %c0_20 = arith.constant 0 : index
      %42 = vector.load %arg7[%c0_18, %c0_19, %c0_20] : memref<1x1x32xf32, #tpu.memory_space<vmem>>, vector<1x1x32xf32>
      %43 = vector.shape_cast %42 : vector<1x1x32xf32> to vector<1x32xf32>
      %44 = arith.addf %43, %41 : vector<1x32xf32>
      %c0_21 = arith.constant 0 : index
      %c0_22 = arith.constant 0 : index
      %c0_23 = arith.constant 0 : index
      %45 = vector.load %arg7[%c0_21, %c0_22, %c0_23] : memref<1x1x32xf32, #tpu.memory_space<vmem>>, vector<1x1x32xf32>
      %46 = vector.shape_cast %45 : vector<1x1x32xf32> to vector<1x32xf32>
      %47 = vector.shape_cast %44 : vector<1x32xf32> to vector<1x1x32xf32>
      tpu.vector_store %arg7[%c0_21, %c0_22, %c0_23], %47 {strides = array<i32>} : memref<1x1x32xf32, #tpu.memory_space<vmem>>, vector<1x1x32xf32>,
      %c0_24 = arith.constant 0 : index
      %c0_25 = arith.constant 0 : index
      %c0_26 = arith.constant 0 : index
      %48 = vector.load %arg8[%c0_24, %c0_25, %c0_26] : memref<1x1x1xf32, #tpu.memory_space<vmem>>, vector<1x1x1xf32>
      %49 = vector.shape_cast %48 : vector<1x1x1xf32> to vector<1x1xf32>
      %cst_27 = arith.constant dense<0.000000e+00> : vector<1xf32>
      %50 = vector.multi_reduction <add>, %31, %cst_27 [1] : vector<1x64xf32> to vector<1xf32>
      %51 = vector.shape_cast %50 : vector<1xf32> to vector<1x1xf32>
      %52 = arith.addf %49, %51 : vector<1x1xf32>
      %c0_28 = arith.constant 0 : index
      %c0_29 = arith.constant 0 : index
      %c0_30 = arith.constant 0 : index
      %53 = vector.load %arg8[%c0_28, %c0_29, %c0_30] : memref<1x1x1xf32, #tpu.memory_space<vmem>>, vector<1x1x1xf32>
      %54 = vector.shape_cast %53 : vector<1x1x1xf32> to vector<1x1xf32>
      %55 = vector.shape_cast %52 : vector<1x1xf32> to vector<1x1x1xf32>
      tpu.vector_store %arg8[%c0_28, %c0_29, %c0_30], %55 {strides = array<i32>} : memref<1x1x1xf32, #tpu.memory_space<vmem>>, vector<1x1x1xf32>,
    } else {
    }
    return
  }
  func.func @transform_0(%arg0: i32, %arg1: i32) -> (i32, i32) {
    %c2_i32 = arith.constant 2 : i32
    %0 = arith.muli %arg0, %c2_i32 : i32
    %1 = arith.addi %0, %arg1 : i32
    %c2_i32_0 = arith.constant 2 : i32
    %2 = arith.minsi %1, %c2_i32_0 : i32
    %c0_i32 = arith.constant 0 : i32
    %c0_i32_1 = arith.constant 0 : i32
    return %2, %c0_i32 : i32, i32
  }
  func.func @transform_1(%arg0: i32, %arg1: i32) -> (i32, i32) {
    %c2_i32 = arith.constant 2 : i32
    %0 = arith.muli %arg0, %c2_i32 : i32
    %1 = arith.addi %0, %arg1 : i32
    %c2_i32_0 = arith.constant 2 : i32
    %2 = arith.minsi %1, %c2_i32_0 : i32
    %c0_i32 = arith.constant 0 : i32
    %c0_i32_1 = arith.constant 0 : i32
    return %2, %c0_i32 : i32, i32
  }
  func.func @transform_2(%arg0: i32, %arg1: i32) -> (i32, i32) {
    %c0_i32 = arith.constant 0 : i32
    %c0_i32_0 = arith.constant 0 : i32
    %c0_i32_1 = arith.constant 0 : i32
    return %c0_i32, %c0_i32_0 : i32, i32
  }
  func.func @transform_3(%arg0: i32, %arg1: i32) -> (i32, i32) {
    %c0_i32 = arith.constant 0 : i32
    %c0_i32_0 = arith.constant 0 : i32
    %c0_i32_1 = arith.constant 0 : i32
    return %c0_i32, %c0_i32_0 : i32, i32
  }
  func.func @transform_4(%arg0: i32, %arg1: i32) -> i32 {
    %c0_i32 = arith.constant 0 : i32
    %c0_i32_0 = arith.constant 0 : i32
    return %c0_i32 : i32
  }
  func.func @transform_5(%arg0: i32, %arg1: i32) -> (i32, i32, i32) {
    %c0_i32 = arith.constant 0 : i32
    %c0_i32_0 = arith.constant 0 : i32
    %c0_i32_1 = arith.constant 0 : i32
    return %arg0, %c0_i32, %c0_i32_0 : i32, i32, i32
  }
  func.func @transform_6(%arg0: i32, %arg1: i32) -> (i32, i32, i32) {
    %c0_i32 = arith.constant 0 : i32
    %c0_i32_0 = arith.constant 0 : i32
    %c0_i32_1 = arith.constant 0 : i32
    return %arg0, %c0_i32, %c0_i32_0 : i32, i32, i32
  }
}

</mosaic_0001>

<bundles_post_ra>
// kernel: tpu_custom_call.1
= control target key start
LH: loop header
LB: loop body
LE: loop exit
PB: predicated region body
PF: predicated region fallthrough
CT: control target
= control target key end

     0   :  { %s1675_s0 = inlined_call_operand.vmem [shape: f32[160,16], index: 0, kind: input, shape index: {}]   ;;  %s1676_s1 = inlined_call_operand.vmem [shape: f32[160,32], index: 1, kind: input, shape index: {}]   ;;  %s1677_s2 = inlined_call_operand.vmem [shape: f32[1,16], index: 2, kind: input, shape index: {}]   ;;  %s1678_s3 = inlined_call_operand.vmem [shape: f32[1,32], index: 3, kind: input, shape index: {}]   ;;  %s1679_s4 = inlined_call_operand.<no memory space> [shape: f32[1], index: 4, kind: input, shape index: {}]   ;;  %s1680_s5 = inlined_call_operand.hbm [shape: f32[2,1,32], index: 5, kind: output, shape index: {0}]   ;;  %s1681_s6 = inlined_call_operand.vmem [shape: f32[2,1,1], index: 6, kind: output, shape index: {1}]  }
   0x1   :  { %12 = sst [smem:[#allocation2]] %s1679_s4 }
   0x2   :  { %13 = vsyncpa [#allocation4], 0 }
   0x3   :  { %15 = vsyncpa [#allocation4 + $0x1], 0  ;;  %s1427_s23 = smov 0   ;;  %s1429_s24 = smov 0  }
   0x4   :  { %s1431_s25 = smov 0   ;;  %s1433_s26 = smov 0  }
   0x5   :  { %s1435_s27 = smov 0   ;;  %s1437_s28 = smov 0  }
   0x6   :  { %s1439_s29 = smov 0   ;;  %s1441_s30 = smov 0  }
   0x7 LB: > { %1684 = sst [smem:[#allocation6_spill]] %s1372_s29  ;;  %s974_s4 = sadd.s32 4294967295, %s1376_s30   ;;  %s1376_s30 = sphi %s1441_s30, %s21_s30   ;;  %s1372_s29 = sphi %s1439_s29, %s1697_s29   ;;  %s1368_s28 = sphi %s1437_s28, %s1702_s28   ;;  %s1364_s27 = sphi %s1435_s27, %s1695_s27   ;;  %s1360_s26 = sphi %s1433_s26, %s1701_s26   ;;  %s1356_s25 = sphi %s1431_s25, %s1700_s25   ;;  %s1352_s24 = sphi %s1429_s24, %s1699_s24   ;;  %s1348_s23 = sphi %s1427_s23, %s1698_s23  }
   0x8   : > { %s975_s7 = sadd.s32 4294967294, %s1376_s30   ;;  %s30_s8 = sadd.s32 1, %s1368_s28 }
   0x9   : > { %p31_p0 = scmp.ge.s32.totalorder %s30_s8, 2  ;;  %s33_s9 = sadd.s32 1, %s1372_s29 }
   0xa   : > { %p181_p1 = scmp.ne.s32.totalorder %s1356_s25, %s1352_s24  ;;  %p182_p2 = scmp.eq.s32.totalorder %s974_s4, 3 }
   0xb   : > { %s1704_s8 = smov (%p31_p0, %s30_s8), 0  ;;  %s1706_s9 = smov (!%p31_p0, %s33_s9), %s1372_s29 }
   0xc   : > { %1685 = sst [smem:[#allocation7_spill]] %s1704_s8  ;;  %p1476_p3 = por %p182_p2, %p181_p1 }
   0xd   : > { %p187_p4 = scmp.ne.s32.totalorder %s1352_s24, %s1348_s23  ;;  %p35_p5 = scmp.ge.s32.totalorder %s1706_s9, 2 }
   0xe   : > { %p188_p6 = scmp.eq.s32.totalorder %s975_s7, 3  ;;  %p982_p7 = scmp.ge.s32.totalorder %s1376_s30, 1 }
   0xf   : > { %p291_p8 = scmp.lt.s32.totalorder %s1376_s30, 5  ;;  %s1708_s9 = smov (%p35_p5, %s1706_s9), 0 }
  0x10   : > { %1687 = sst [smem:[#allocation8_spill]] %s1708_s9  ;;  %p1486_p9 = por %p188_p6, %p187_p4 }
  0x11   : > { %p292_p10 = pnand %p982_p7, %p291_p8  ;;  %s168_s12 = ssub.s32 %s1372_s29, %s1708_s9 }
  0x12   : > { %s171_s13 = sadd.s32 1, %s1356_s25  ;;  %p169_p11 = scmp.eq.s32.totalorder %s168_s12, 0 }
  0x13   : > { %295 = sbr.rel (%p292_p10) target bundleno = 793 (0x319), region = 40  ;;  %s983_s16 = sshll.u32 (!%p292_p10), %s1364_s27, 1 }
  0x14   : > { %s1494_s14 = scalar_select %p169_p11, %s1356_s25, %s171_s13  }
  0x15   : > { %s1499_s17 = sadd.s32 (!%p292_p10), %s1360_s26, %s983_s16  ;;  %p388_p13 = scmp.lt.s32.totalorder (!%p292_p10), %s1364_s27, 1 }
  0x16   : > { %p346_p12 = scmp.lt.s32.totalorder (!%p292_p10), %s1499_s17, 2  ;;  %s1689_s29 = sand.u32 (!%p292_p10), 1, %s1352_s24  }
  0x17   : > { %p989_p1 = scmp.ne.s32.totalorder (!%p292_p10), %s1360_s26, 0 }
  0x1a   : > { %s347_s18 = scalar_select %p346_p12, %s1499_s17, 2 }
  0x1b   : > { %s389_s19 = scalar_select %p388_p13, %s1364_s27, 1 }
  0x1c   : > { %s984_s20 = sshll.u32 %s347_s18, 3  ;;  %s1522_s18 = scalar_lea.vmem [#allocation3], %s1689_s29  ;;  %vm395_vm0 = vcmask (!%p989_p1), 253952   ;;  %vm397_vm1 = vcmask (!%p989_p1), 0   ;;  %v1378_v0 = vmov (!%p989_p1), 0.0  }
  0x1d   : > { %p353_p0 = scmp.lt.s32.totalorder %s984_s20, 19  ;;  %s1508_s4 = scalar_lea.vmem %s1681_s6, %s389_s19  ;;  %396 = vst.msk [vmem:[%s1522_s18] sm:$0x1] (!%p989_p1), %vm395_vm0, %v1378_v0 }
  0x1e   : > { %394 = sbr.rel (%p989_p1) target bundleno = 37 (0x25), region = 44  ;;  %398 = vst.msk [vmem:[%s1508_s4] sm:$0x1] (!%p989_p1), %vm397_vm1, %v1378_v0 }
  0x1f   : > { %s1710_s20 = smov (!%p353_p0, %s984_s20), 19 }
  0x20   : > { %s985_s7 = sshll.u32 %s1710_s20, 3 }
  0x21   : > { %s1513_s16 = scalar_lea.vmem %s1675_s0, %s985_s7  ;;  %s1518_s8 = scalar_lea.vmem %s1676_s1, %s985_s7 }
  0x25 PF: > { %v407_v1 = vld [vmem:[%s1518_s8] sm:$0xff]  ;;  %v408_v2 = vld [vmem:[%s1518_s8 + $0x8] sm:$0xff]  ;;  %vm417_vm2 = vcmask 261120   ;;  %vm515_vm3 = vcmask 130048   ;;  %v1379_v4 = vmov 0.0|0.0   ;;  %vm1380_vm6 = vmmov 0  }
  0x26   : > { %v399_v3 = vld [vmem:[%s1513_s16] sm:$0xff]  ;;  %1137 = vmatprep.subr.bf16.mxu0 %v1379_v4  ;;  %1153 = vmatprep.subr.bf16.mxu1 %v1379_v4  ;;  %v1530_v5 = vpack.c.bf16 %v408_v2, %v407_v1  ;;  %vm1534_vm4 = vmpackc.low %vm417_vm2, %vm417_vm2  ;;  %v400_v7 = vld [vmem:[%s1513_s16 + $0x8] sm:$0xff]  ;;  %v1381_v10 = vmov 0.0   ;;  %s613_s20 = sld [smem:[#allocation2]] }
  0x27   : > { %v1154_v8 = vpack.c.bf16 %v400_v7, %v399_v3  ;;  %vm1541_vm5 = vmpackc.low %vm515_vm3, %vm515_vm3  ;;  %1077 = vmatprep.mubr.msk.f32.mxu0 %vm1380_vm6, %v1381_v10  ;;  %1096 = vmatprep.mubr.msk.f32.mxu1 %vm1380_vm6, %v1381_v10  ;;  %v409_v11 = vld [vmem:[%s1518_s8 + $0x10] sm:$0xff]  ;;  %v410_v12 = vld [vmem:[%s1518_s8 + $0x18] sm:$0xff] }
  0x28   : > { %1140 = vmatpush3.bf16.xpose.msk.msra.mxu0 %vm1534_vm4, %v1530_v5  ;;  %v401_v13 = vld [vmem:[%s1513_s16 + $0x10] sm:$0xff]  ;;  %v402_v14 = vld [vmem:[%s1513_s16 + $0x18] sm:$0xff]  ;;  %v1554_v15 = vpack.c.bf16 %v410_v12, %v409_v11  ;;  %v411_v17 = vld [vmem:[%s1518_s8 + $0x20] sm:$0xff] }
  0x29   : > { %1156 = vmatpush3.bf16.xpose.msk.msra.mxu1 %vm1541_vm5, %v1154_v8  ;;  %1141 = vmatprep.subr.bf16.mxu0 %v1379_v4  ;;  %v1158_v16 = vpack.c.bf16 %v402_v14, %v401_v13  ;;  %v412_v18 = vld [vmem:[%s1518_s8 + $0x28] sm:$0xff]  ;;  %v403_v19 = vld [vmem:[%s1513_s16 + $0x20] sm:$0xff]  ;;  %v413_v23 = vld [vmem:[%s1518_s8 + $0x30] sm:$0xff] }
  0x2a   : > { %1157 = vmatprep.subr.bf16.mxu1 %v1379_v4  ;;  %v404_v20 = vld [vmem:[%s1513_s16 + $0x28] sm:$0xff]  ;;  %v1565_v21 = vpack.c.bf16 %v412_v18, %v411_v17  ;;  %v414_v24 = vld [vmem:[%s1518_s8 + $0x38] sm:$0xff]  ;;  %v405_v25 = vld [vmem:[%s1513_s16 + $0x30] sm:$0xff]  ;;  %s1009_s8 = sshll.u32 %s1499_s17, 6 }
  0x2b   : > { %v1162_v22 = vpack.c.bf16 %v404_v20, %v403_v19  ;;  %v406_v26 = vld [vmem:[%s1513_s16 + $0x38] sm:$0xff]  ;;  %v1576_v27 = vpack.c.bf16 %v414_v24, %v413_v23  ;;  %v416_v29 = vld [vmem:[%s1678_s3] sm:$0x1]  ;;  %s1594_s19 = sadd.s32 64, %s1009_s8 }
  0x2c   : > { %v1166_v28 = vpack.c.bf16 %v406_v26, %v405_v25  ;;  %v415_v30 = vld [vmem:[%s1677_s2] sm:$0x1]  ;;  %v614_v33 = vstv %s613_s20  ;;  %p1010_p2 = scmp.gt.s32.totalorder %s1594_s19, 160 }
  0x2d   : > { %v1382_v41 = vmov (!%p1010_p2), 0.0|0.0   ;;  %vm1383_vm7 = vmmov (!%p1010_p2), 0   ;;  %v1384_v42 = vmov (!%p1010_p2), 0.0   ;;  %vm707_vm8 = vcmask (!%p1010_p2), 516096   ;;  %v706_v44 = vld [vmem:[%s1508_s4] sm:$0x1] (!%p1010_p2) }
  0x2e   : > { %vm628_vm9 = vcmask (!%p1010_p2), 523264   ;;  %vm712_vm10 = vcmask (!%p1010_p2), 0   ;;  %v702_v47 = vld [vmem:[%s1522_s18] sm:$0x1] (!%p1010_p2)  ;;  %vm704_vm11 = vcmask (!%p1010_p2), 253952  }
  0x30   : > { %1144 = vmatpush3.bf16.xpose.msk.msra.mxu0 %vm1534_vm4, %v1554_v15 }
  0x31   : > { %1160 = vmatpush3.bf16.xpose.msk.msra.mxu1 %vm1541_vm5, %v1158_v16  ;;  %1145 = vmatprep.subr.bf16.mxu0 %v1379_v4 }
  0x32   : > { %1161 = vmatprep.subr.bf16.mxu1 %v1379_v4 }
  0x38   : > { %1148 = vmatpush3.bf16.xpose.msk.msra.mxu0 %vm1534_vm4, %v1565_v21 }
  0x39   : > { %1164 = vmatpush3.bf16.xpose.msk.msra.mxu1 %vm1541_vm5, %v1162_v22  ;;  %1149 = vmatprep.subr.bf16.mxu0 %v1379_v4 }
  0x3a   : > { %1165 = vmatprep.subr.bf16.mxu1 %v1379_v4 }
  0x40   : > { %1152 = vmatpush3.bf16.xpose.msk.msra.mxu0 %vm1534_vm4, %v1576_v27 }
  0x41   : > { %1168 = vmatpush3.bf16.xpose.msk.msra.mxu1 %vm1541_vm5, %v1166_v28  ;;  %1169 = vmatprep.subr.bf16.mxu0 (!%p1010_p2), %v1382_v41 }
  0x47   : > { %1078 = vmatmul.mubr.msk.f32.vlgmr.msra.gmra.mrb[0].mxu0 %vm417_vm2, %v416_v29 }
  0x48   : > { %1097 = vmatmul.mubr.msk.f32.vlgmr.msra.gmra.mrb[0].mxu1 %vm515_vm3, %v415_v30  ;;  %1115 = vmatprep.mubr.msk.f32.mxu0 (!%p1010_p2), %vm1383_vm7, %v1384_v42 }
  0x49   : > { %1171 = vmatpush3.bf16.msra.mxu0 (!%p1010_p2), %v1530_v5 }
  0x4a   : > { %1172 = vmatprep.subr.bf16.mxu0 (!%p1010_p2), %v1382_v41 }
  0x4d   : > { %1174 = vmatpush3.bf16.msra.mxu0 (!%p1010_p2), %v1554_v15 }
  0x4e   : > { %1175 = vmatprep.subr.bf16.mxu0 (!%p1010_p2), %v1382_v41 }
  0x51   : > { %1177 = vmatpush3.bf16.msra.mxu0 (!%p1010_p2), %v1565_v21 }
  0x52   : > { %1178 = vmatprep.subr.bf16.mxu0 (!%p1010_p2), %v1382_v41 }
  0x55   : > { %1180 = vmatpush3.bf16.msra.mxu0 (!%p1010_p2), %v1576_v27 }
 0x11a   : > { %v511_v31 = vpop.f32.mrb[0].mxu0 }
 0x11b   : > { %v609_v32 = vpop.f32.mrb[0].mxu1  ;;  %v1079_v34 = vpop.f32.mrb[1].mxu0 }
 0x11c   : > { %v610_v35 = vadd.f32 %v609_v32, %v511_v31  ;;  %v1098_v36 = vpop.f32.mrb[1].mxu1 }
 0x11e   : > { %v615_v37 = vadd.f32 %v614_v33, %v610_v35 }
 0x120   : > { %1278 = vtanh.f32 %v615_v37 }
 0x12a   : > { %v1279_v38 = vpop.eup %1278 }
 0x12b   : > { %v617_v39 = vmul.f32 1.442695, %v1279_v38 }
 0x12d   : > { %1280 = vpow2.f32 %v617_v39 }
 0x131   : > { %627 = sbr.rel (%p1010_p2) target bundleno = 527 (0x20f), region = 48 }
 0x137   : > { %v1596_v40 = vpop.eup %1280 }
 0x138   : > { %v708_v43 = vsel %vm707_vm8, %v1596_v40, 0.0  ;;  %1116 = vmatmul.mubr.msk.f32.vlgmr.msra.gmra.mrb[0].mxu0 %vm628_vm9, %v1596_v40 }
 0x139   : > { %709 = vadd.xlane.f32.xlu0 %v708_v43 }
 0x1c6   : > { %v710_v45 = vpop.xlane.xlu0 %709 }
 0x1c7   : > { %v711_v46 = vadd.f32 %v710_v45, %v706_v44 }
 0x1c9   : > { %713 = vst.msk [vmem:[%s1508_s4] sm:$0x1] %vm712_vm10, %v711_v46 }
 0x20b   : > { %v698_v48 = vpop.f32.mrb[0].mxu0 }
 0x20c   : > { %v703_v49 = vadd.f32 %v702_v47, %v698_v48  ;;  %v1117_v50 = vpop.f32.mrb[1].mxu0 }
 0x20e   : > { %705 = vst.msk [vmem:[%s1522_s18] sm:$0x1] %vm704_vm11, %v703_v49 }
 0x20f PF: > { %p1012_p4 = scmp.le.s32.totalorder %s1594_s19, 160 }
 0x210   : > { %v717_v51 = vlaneseq (!%p1012_p4)  ;;  %v1385_v52 = vmov (!%p1012_p4), 0.0|0.0   ;;  %v719_v53 = vstv (!%p1012_p4), %s1009_s8  ;;  %vm1386_vm12 = vmmov (!%p1012_p4), 0  }
 0x211   : > { %716 = sbr.rel (%p1012_p4) target bundleno = 768 (0x300), region = 52  ;;  %1181 = vmatprep.subr.bf16.mxu0 (!%p1012_p4), %v1385_v52  ;;  %v1387_v55 = vmov (!%p1012_p4), 0.0   ;;  %vm851_vm2 = vcmask (!%p1012_p4), 516096   ;;  %vm772_vm11 = vcmask (!%p1012_p4), 523264  }
 0x212   : > { %v724_v54 = vshrl.u32 (!%p1012_p4), %v717_v51, 7  ;;  %1134 = vmatprep.mubr.msk.f32.mxu0 (!%p1012_p4), %vm1386_vm12, %v1387_v55  ;;  %v718_v56 = vand.u32 (!%p1012_p4), 127, %v717_v51  ;;  %vm856_vm12 = vcmask (!%p1012_p4), 0  }
 0x214   : > { %v725_v57 = vadd.s32 (!%p1012_p4), 8, %v724_v54  ;;  %v732_v58 = vadd.s32 (!%p1012_p4), %v724_v54, %v719_v53  ;;  %v726_v59 = vadd.s32 (!%p1012_p4), 16, %v724_v54  ;;  %v727_v60 = vadd.s32 (!%p1012_p4), 24, %v724_v54 }
 0x215   : > { %v728_v61 = vadd.s32 (!%p1012_p4), 32, %v724_v54  ;;  %v729_v62 = vadd.s32 (!%p1012_p4), 40, %v724_v54  ;;  %v730_v4 = vadd.s32 (!%p1012_p4), 48, %v724_v54  ;;  %v731_v6 = vadd.s32 (!%p1012_p4), 56, %v724_v54  ;;  %v846_v14 = vld [vmem:[%s1522_s18] sm:$0x1] (!%p1012_p4) }
 0x216   : > { %v733_v63 = vadd.s32 (!%p1012_p4), %v725_v57, %v719_v53  ;;  %vm740_vm13 = vcmp.lt.s32.totalorder (!%p1012_p4), %v732_v58, 160  ;;  %v734_v0 = vadd.s32 (!%p1012_p4), %v726_v59, %v719_v53  ;;  %v735_v1 = vadd.s32 (!%p1012_p4), %v727_v60, %v719_v53 }
 0x217   : > { %v736_v2 = vadd.s32 (!%p1012_p4), %v728_v61, %v719_v53  ;;  %v737_v3 = vadd.s32 (!%p1012_p4), %v729_v62, %v719_v53  ;;  %v720_v7 = vadd.s32 (!%p1012_p4), %v719_v53, %v718_v56  ;;  %v738_v8 = vadd.s32 (!%p1012_p4), %v730_v4, %v719_v53 }
 0x218   : > { %vm741_vm14 = vcmp.lt.s32.totalorder %v733_v63, 160  ;;  %vm742_vm15 = vcmp.lt.s32.totalorder %v734_v0, 160  ;;  %vm743_vm0 = vcmp.lt.s32.totalorder %v735_v1, 160  ;;  %v739_v10 = vadd.s32 %v731_v6, %v719_v53 }
 0x219   : > { %vm1183_vm1 = vmpackc.low %vm741_vm14, %vm740_vm13  ;;  %vm721_vm3 = vcmp.lt.s32.totalorder %v720_v7, 160  ;;  %vm744_vm5 = vcmp.lt.s32.totalorder %v736_v2, 160  ;;  %vm745_vm6 = vcmp.lt.s32.totalorder %v737_v3, 160  ;;  %vm746_vm8 = vcmp.lt.s32.totalorder %v738_v8, 160 }
 0x21a   : > { %1184 = vmatpush3.bf16.msk.msra.mxu0 %vm1183_vm1, %v1530_v5  ;;  %vm1187_vm4 = vmpackc.low %vm743_vm0, %vm742_vm15  ;;  %v722_v9 = vsel %vm721_vm3, %v1596_v40, 0.0  ;;  %vm747_vm9 = vcmp.lt.s32.totalorder %v739_v10, 160  ;;  %v850_v5 = vld [vmem:[%s1508_s4] sm:$0x1]  ;;  %vm848_vm13 = vcmask 253952  }
 0x21b   : > { %1185 = vmatprep.subr.bf16.mxu0 %v1385_v52  ;;  %v852_v11 = vsel %vm851_vm2, %v722_v9, 0.0  ;;  %vm1191_vm7 = vmpackc.low %vm745_vm6, %vm744_vm5 }
 0x21c   : > { %853 = vadd.xlane.f32.xlu0 %v852_v11  ;;  %vm1195_vm10 = vmpackc.low %vm747_vm9, %vm746_vm8 }
 0x21e   : > { %1188 = vmatpush3.bf16.msk.msra.mxu0 %vm1187_vm4, %v1554_v15 }
 0x21f   : > { %1189 = vmatprep.subr.bf16.mxu0 %v1385_v52 }
 0x222   : > { %1192 = vmatpush3.bf16.msk.msra.mxu0 %vm1191_vm7, %v1565_v21 }
 0x223   : > { %1193 = vmatprep.subr.bf16.mxu0 %v1385_v52 }
 0x226   : > { %1196 = vmatpush3.bf16.msk.msra.mxu0 %vm1195_vm10, %v1576_v27 }
 0x229   : > { %1135 = vmatmul.mubr.msk.f32.vlgmr.msra.gmra.mrb[0].mxu0 %vm772_vm11, %v722_v9 }
 0x2a9   : > { %v854_v12 = vpop.xlane.xlu0 %853 }
 0x2aa   : > { %v855_v13 = vadd.f32 %v854_v12, %v850_v5 }
 0x2ac   : > { %857 = vst.msk [vmem:[%s1508_s4] sm:$0x1] %vm856_vm12, %v855_v13 }
 0x2fc   : > { %v842_v15 = vpop.f32.mrb[0].mxu0 }
 0x2fd   : > { %v847_v16 = vadd.f32 %v846_v14, %v842_v15  ;;  %v1136_v17 = vpop.f32.mrb[1].mxu0 }
 0x2ff   : > { %849 = vst.msk [vmem:[%s1522_s18] sm:$0x1] %vm848_vm13, %v847_v16 }
 0x300 PF: > { %s1022_s17 = sshll.u32 %s1364_s27, 4  ;;  %s874_s12 = sshll.u32 %s1522_s18, 4  ;;  %s875_s12 = int_to_ptr.vmem [resolvable:$true] %s874_s12 }
 0x301   : > { %s1625_s7 = scalar_lea.hbm %s1680_s5, %s1022_s17  ;;  %s1694_s4 = sand.u32 1, %s1352_s24  }
 0x302   : > { %s859_s13 = scalar_lea.sflag [#allocation4], %s1694_s4  ;;  %s1282_s16 = scalar_lea.vmem %s875_s12, 16 }
 0x303   : > { %p1283_p5 = scmp.ne.s32.totalorder %s875_s12, %s1282_s16  ;;  %s1388_s26 = smov [#allocation3]  }
 0x304   : > { %s1286_s29 = sshll.u32 %s1388_s26, 4  ;;  %s1287_s29 = int_to_ptr.vmem [resolvable:$false] %s1286_s29 }
 0x305   : > { %p1284_p6 = pnand %p1283_p5, %p1476_p3  ;;  %s1288_s9 = scalar_lea.vmem %s1287_s29, 32 }
 0x306   : > { %p1289_p8 = scmp.lt.s32.totalorder %s875_s12, %s1287_s29  ;;  %p1290_p10 = scmp.lt.s32.totalorder %s1288_s9, %s1282_s16 }
 0x307   : > { %p1285_p7 = pneg %p1284_p6 }
 0x308   : > { %p1291_p11 = por %p1290_p10, %p1289_p8 }
 0x30a   : > { %p1292_p12 = pnand %p1291_p11, %p1285_p7 }
 0x30c   : > { %1295 = shalt.err (!%p1292_p12)
}
 0x30d   : > { %s1296_s27 = scalar_lea.hbm %s1625_s7, 16  ;;  %s1300_s8 = scalar_lea.hbm %s1680_s5, 32 }
 0x30e   : > { %p1297_p13 = scmp.ne.s32.totalorder %s1625_s7, %s1296_s27  ;;  %p1301_p2 = scmp.lt.u32.totalorder %s1625_s7, %s1680_s5 }
 0x30f   : > { %p1302_p4 = scmp.lt.u32.totalorder %s1300_s8, %s1296_s27  ;;  %p1304_p6 = scmp.lt.u32.totalorder %s1296_s27, %s1625_s7 }
 0x310   : > { %p1298_p0 = pnand %p1297_p13, %p1476_p3 }
 0x311   : > { %p1303_p5 = por %p1302_p4, %p1301_p2 }
 0x312   : > { %p1299_p1 = pneg %p1298_p0 }
 0x313   : > { %p1305_p7 = por %p1304_p6, %p1303_p5 }
 0x315   : > { %p1306_p8 = pnand %p1305_p7, %p1299_p1 }
 0x317   : > { %1309 = shalt.err (!%p1306_p8)
}
 0x318   : > { %1197 = dma.vmem_to_hbm [thread:$0]  (%p1476_p3), %s875_s12, 16, %s1625_s7, %s859_s13  }
 0x319 PF: > { %p1203_p10 = scmp.ge.s32.totalorder %s1376_s30, 2  ;;  %s889_s17 = sand.u32 1, %s1348_s23  }
 0x31a   : > { %s890_s21 = scalar_lea.sflag [#allocation4], %s889_s17 }
 0x31b   : > { %p1200_p11 = pnand %p1203_p10, %p1486_p9 }
 0x31d   : > { %1343 = dma.done.wait (!%p1200_p11), %s890_s21, 16  }
 0x31e   : > { %1345 = vsyncadd (!%p1200_p11), %s890_s21, 4294967280  ;;  %s21_s30 = sadd.s32 1, %s1376_s30   ;;  %s1695_s27 = sld [smem:[#allocation6_spill]] }
 0x31f   : > { %p18_p12 = scmp.ge.s32.totalorder %s21_s30, 6   ;;  %s1696_s10 = sld [smem:[#allocation7_spill]] }
 0x320   : > { %s1697_s29 = sld [smem:[#allocation8_spill]]  ;;  %s1698_s23 = smov %s1352_s24 }
 0x321   : > { %s1699_s24 = smov %s1356_s25  ;;  %s1700_s25 = smov %s1494_s14 }
 0x322   : > { %s1701_s26 = smov %s1368_s28  ;;  %20 = sbr.rel (!%p18_p12) target bundleno = 7 (0x7), region = 102 }
 0x325   : > { %s1702_s28 = smov %s1696_s10 }
 0x329   :  { %900 = vsyncpa [#allocation4], 1 }
 0x32a   :  { %902 = vsyncpa [#allocation4 + $0x1], 1 }

</bundles_post_ra>
